<compile_context>
chip_gen: v7x
topology: tpu7x:2x2x1
jax: 0.10.0
libtpu: 0.0.40
codegen_flags: <defaults>
</compile_context>

<pallas_src>
import math

import jax
import jax.numpy as jnp
import numpy as np
from jax.experimental import pallas as pl
from jax.experimental.pallas import tpu as pltpu

# Architecture constants fixed by CreateBase defaults in the PyTorch module.
N_FILTERS_TIME = 10     # conv_time output channels
N_FILTERS_SPAT = 40     # conv_spat output channels
FILTER_TIME = 25        # conv_time kernel length along time
POOL_LEN = 75           # AvgPool2d kernel along time
POOL_STRIDE = 15        # AvgPool2d stride along time
BN_EPS = 1e-5           # BatchNorm2d default eps
SAFE_LOG_EPS = 1e-6     # braindecode safe_log clamp


def _xavier_uniform(key, shape, fan_in, fan_out):
    bound = math.sqrt(6.0 / (fan_in + fan_out))
    return jax.random.uniform(key, shape, jnp.float32, -bound, bound)


def init_params(key, in_chans, input_time_length, n_classes):
    """Deterministic synthetic parameters with the shapes implied by __init__."""
    K, F, C = N_FILTERS_TIME, N_FILTERS_SPAT, in_chans
    T1 = input_time_length - FILTER_TIME + 1
    P = (T1 - POOL_LEN) // POOL_STRIDE + 1
    assert P == 2, "module hard-codes n_out_time = 2; pick input_time_length in [114, 128]"

    k1, k2, k3, k4, k5 = jax.random.split(key, 5)

    # conv_time: torch weight (K, 1, 25, 1) -> stored as (K, 25); bias init to 0.
    wt = _xavier_uniform(k1, (K, FILTER_TIME), fan_in=FILTER_TIME, fan_out=K * FILTER_TIME)
    bt = jnp.zeros((K,), jnp.float32)

    # conv_spat: torch weight (F, K, 1, C) -> stored as (K, C, F); no bias (batch_norm=True).
    wsp = _xavier_uniform(k2, (K, C, F), fan_in=K * C, fan_out=F * C)

    # BatchNorm2d(F): gamma=1, beta=0 per init; eval-mode running stats (synthetic, deterministic).
    gamma = jnp.ones((F,), jnp.float32)
    beta = jnp.zeros((F,), jnp.float32)
    running_mean = 0.1 * jax.random.normal(k3, (F,), jnp.float32)
    running_var = jax.random.uniform(k4, (F,), jnp.float32, 0.5, 1.5)
    bn_scale = gamma / jnp.sqrt(running_var + BN_EPS)
    bn_shift = beta - running_mean * bn_scale

    # classifier conv: torch weight (n_classes, F, P, 1) -> stored as (P, F, n_classes); bias 0.
    wcls = _xavier_uniform(k5, (P, F, n_classes), fan_in=F * P, fan_out=n_classes * P)
    bcls = jnp.zeros((1, n_classes), jnp.float32)

    return {
        "wt": wt, "bt": bt, "wsp": wsp,
        "bn_scale": bn_scale.reshape(1, F), "bn_shift": bn_shift.reshape(1, F),
        "wcls": wcls, "bcls": bcls,
    }


def _make_kernel(B_tile, P):
    """Kernel body; per grid step it processes B_tile samples end-to-end."""
    def kernel(x_ref, w_ref, shift_ref, apool_ref, wcls_ref, bcls_ref, out_ref):
        # --- folded conv_time + conv_spat + BN scale: one lane-dense MXU matmul ---
        x = x_ref[0]                                                     # (B_tile*T1, 25*C)
        acc = jnp.dot(x, w_ref[...], preferred_element_type=jnp.float32)  # (B_tile*T1, F)

        # --- BN shift (bias+mean folded in), square nonlinearity ---
        feat = acc + shift_ref[...]
        feat = feat * feat

        # --- AvgPool2d((75,1), stride (15,1)) as a matmul against the averaging matrix ---
        pooled = jnp.dot(apool_ref[...], feat,
                         preferred_element_type=jnp.float32)            # (P*B_tile, F), p-major rows
        pooled = jnp.log(jnp.maximum(pooled, SAFE_LOG_EPS))             # safe_log
        # Dropout(p=0.75): identity at inference.
        # TODO(synk): training-mode dropout masking / batch-stat BN not reproduced (eval semantics).

        # --- classifier Conv2d(F, NCLS, (P,1)) as one fused dot + LogSoftmax(dim=1) ---
        cat = jnp.concatenate(
            [pooled[p * B_tile:(p + 1) * B_tile, :] for p in range(P)], axis=1)   # (B_tile, P*F)
        logits = jnp.dot(cat, wcls_ref[...],
                         preferred_element_type=jnp.float32) + bcls_ref[...]      # (B_tile, NCLS)
        m = jnp.max(logits, axis=1, keepdims=True)
        z = logits - m
        lse = jnp.log(jnp.sum(jnp.exp(z), axis=1, keepdims=True))
        out_ref[0] = z - lse
    return kernel


def eeg_shallow_forward(data, params):
    """data: (B, in_chans, time, 1) float32 (torch NCHW). Returns (B, n_classes) log-probs."""
    B, C, T, W = data.shape
    assert W == 1
    K, F = N_FILTERS_TIME, N_FILTERS_SPAT
    T1 = T - FILTER_TIME + 1
    P = (T1 - POOL_LEN) // POOL_STRIDE + 1
    assert P == 2
    NCLS = params["wcls"].shape[-1]

    # ---- offline weight folding (tiny XLA ops, done once outside the kernel) ----
    bn_scale = params["bn_scale"][0]                                   # (F,)
    bn_shift = params["bn_shift"][0]                                   # (F,)
    # W_comb[tau, c, f] = sum_k wt[k,tau] * wsp[k,c,f], then fold BN scale into its columns.
    wcomb = jnp.einsum("kt,kcf->tcf", params["wt"], params["wsp"])     # (25, C, F)
    w_flat = (wcomb * bn_scale[None, None, :]).reshape(FILTER_TIME * C, F)
    # conv_time bias propagated through wsp and bn_scale into the shift term.
    bias_f = jnp.einsum("k,kcf->f", params["bt"], params["wsp"])       # (F,)
    shift = (bn_scale * bias_f + bn_shift).reshape(1, F)
    # classifier weight flattened p-major (matches the p-major lane concat in the kernel).
    wcls_flat = params["wcls"].reshape(P * F, NCLS)
    bcls = params["bcls"]                                              # (1, NCLS)

    # ---- batching: 2 parallel grid steps (keeps both v7x TCs busy), B_tile samples each ----
    n_steps = 2 if B >= 2 else 1
    B_tile = (B + n_steps - 1) // n_steps
    B_pad = n_steps * B_tile

    # _transpose_time_to_spat + drop trailing singleton: layout (B, time, in_chans)
    x = jnp.transpose(data[..., 0], (0, 2, 1)).astype(jnp.float32)     # (B, T, C)
    if B_pad != B:
        x = jnp.concatenate([x, jnp.zeros((B_pad - B, T, C), jnp.float32)], axis=0)

    # im2col in XLA: x_unfold[b, t, tau*C + c] = x[b, t+tau, c]
    x_unfold = jnp.concatenate(
        [x[:, tau:tau + T1, :] for tau in range(FILTER_TIME)], axis=-1)           # (B_pad, T1, 25*C)
    x_unfold = x_unfold.reshape(n_steps, B_tile * T1, FILTER_TIME * C)

    # Precomputed averaging matrix (block-diagonal over samples, p-major rows).
    apool_np = np.zeros((P * B_tile, B_tile * T1), np.float32)
    for b in range(B_tile):
        for p in range(P):
            s0 = b * T1 + p * POOL_STRIDE
            apool_np[p * B_tile + b, s0:s0 + POOL_LEN] = 1.0 / POOL_LEN
    apool = jnp.asarray(apool_np)

    kernel = _make_kernel(B_tile, P)

    out = pl.pallas_call(
        kernel,
        out_shape=jax.ShapeDtypeStruct((n_steps, B_tile, NCLS), jnp.float32),
        grid=(n_steps,),
        in_specs=[
            pl.BlockSpec((1, B_tile * T1, FILTER_TIME * C), lambda s: (s, 0, 0)),  # im2col tile
            pl.BlockSpec((FILTER_TIME * C, F), lambda s: (0, 0)),                  # folded conv weight
            pl.BlockSpec((1, F), lambda s: (0, 0)),                                # folded BN shift
            pl.BlockSpec((P * B_tile, B_tile * T1), lambda s: (0, 0)),             # avg-pool matrix
            pl.BlockSpec((P * F, NCLS), lambda s: (0, 0)),                         # classifier weight
            pl.BlockSpec((1, NCLS), lambda s: (0, 0)),                             # classifier bias
        ],
        out_specs=pl.BlockSpec((1, B_tile, NCLS), lambda s: (s, 0, 0)),
        compiler_params=pltpu.CompilerParams(dimension_semantics=("parallel",)),
    )(x_unfold, w_flat, shift, apool, wcls_flat, bcls)

    return out.reshape(B_pad, NCLS)[:B]                                 # (B, NCLS)


def reference_forward(data, params):
    """Pure-JAX reference mirroring the PyTorch forward (eval mode)."""
    B, C, T, _ = data.shape
    x = jnp.transpose(data[..., 0], (0, 2, 1))                          # (B, T, C)
    T1 = T - FILTER_TIME + 1
    P = (T1 - POOL_LEN) // POOL_STRIDE + 1
    hi = jax.lax.Precision.HIGHEST

    xs = jnp.stack([x[:, t:t + T1, :] for t in range(FILTER_TIME)], axis=-1)   # (B, T1, C, 25)
    y1 = jnp.einsum("btcs,ks->bktc", xs, params["wt"], precision=hi)
    y1 = y1 + params["bt"][None, :, None, None]
    y2 = jnp.einsum("bktc,kcf->bft", y1, params["wsp"], precision=hi)          # (B, F, T1)
    y2 = y2 * params["bn_scale"][0][None, :, None] + params["bn_shift"][0][None, :, None]
    y2 = y2 * y2
    pooled = jnp.stack(
        [jnp.mean(y2[:, :, p * POOL_STRIDE:p * POOL_STRIDE + POOL_LEN], axis=-1) for p in range(P)],
        axis=-1)                                                               # (B, F, P)
    pooled = jnp.log(jnp.maximum(pooled, SAFE_LOG_EPS))
    logits = jnp.einsum("bfp,pfn->bn", pooled, params["wcls"], precision=hi) + params["bcls"][0][None, :]
    return jax.nn.log_softmax(logits, axis=1)


if __name__ == "__main__":
    B, IN_CHANS, T, N_CLASSES = 2, 8, 125, 4   # T=125 -> conv time 101 -> pooled length 2 (= n_out_time)

    key = jax.random.PRNGKey(0)
    k_data, k_param = jax.random.split(key)
    data = jax.random.normal(k_data, (B, IN_CHANS, T, 1), jnp.float32)   # torch NCHW input
    params = init_params(k_param, IN_CHANS, T, N_CLASSES)

    out = eeg_shallow_forward(data, params)
    out = jax.block_until_ready(out)
    assert out.shape == (B, N_CLASSES)

    ref = reference_forward(data, params)
    max_err = float(jnp.max(jnp.abs(out - ref)))
    if not (max_err < 1e-2):
        raise AssertionError(f"Pallas kernel mismatch vs reference, max abs err = {max_err}")

    print("KERNEL_OK")
</pallas_src>

<mosaic_0001>
module attributes {stable_mosaic.version = 11 : i64} {
  func.func @kernel(%arg0: i32, %arg1: memref<1x101x200xf32, #tpu.memory_space<vmem>>, %arg2: memref<200x40xf32, #tpu.memory_space<vmem>>, %arg3: memref<1x40xf32, #tpu.memory_space<vmem>>, %arg4: memref<2x101xf32, #tpu.memory_space<vmem>>, %arg5: memref<80x4xf32, #tpu.memory_space<vmem>>, %arg6: memref<1x4xf32, #tpu.memory_space<vmem>>, %arg7: memref<1x1x4xf32, #tpu.memory_space<vmem>>) attributes {dimension_semantics = [#tpu.dimension_semantics<parallel>], iteration_bounds = array<i64: 2>, scalar_prefetch = 0 : i64, scratch_operands = 0 : i64, tpu.core_type = #tpu.core_type<tc>, window_params = [{transform_indices = @transform_0, window_bounds = array<i64: 1, 101, 200>}, {pipeline_mode = #tpu.pipeline_mode<synchronous>, transform_indices = @transform_1, window_bounds = array<i64: 200, 40>}, {pipeline_mode = #tpu.pipeline_mode<synchronous>, transform_indices = @transform_2, window_bounds = array<i64: 1, 40>}, {pipeline_mode = #tpu.pipeline_mode<synchronous>, transform_indices = @transform_3, window_bounds = array<i64: 2, 101>}, {pipeline_mode = #tpu.pipeline_mode<synchronous>, transform_indices = @transform_4, window_bounds = array<i64: 80, 4>}, {pipeline_mode = #tpu.pipeline_mode<synchronous>, transform_indices = @transform_5, window_bounds = array<i64: 1, 4>}, {transform_indices = @transform_6, window_bounds = array<i64: 1, 1, 4>}]} {
    %c0 = arith.constant 0 : index
    %c0_0 = arith.constant 0 : index
    %c0_1 = arith.constant 0 : index
    %0 = vector.load %arg1[%c0, %c0_0, %c0_1] : memref<1x101x200xf32, #tpu.memory_space<vmem>>, vector<1x101x200xf32>
    %1 = vector.shape_cast %0 : vector<1x101x200xf32> to vector<101x200xf32>
    %c0_2 = arith.constant 0 : index
    %c0_3 = arith.constant 0 : index
    %2 = vector.load %arg2[%c0_2, %c0_3] : memref<200x40xf32, #tpu.memory_space<vmem>>, vector<200x40xf32>
    %cst = arith.constant dense<0.000000e+00> : vector<101x40xf32>
    %3 = tpu.matmul %1, %2, %cst {dimension_numbers = #tpu.dot_dimension_numbers<[1], [0], [0], [1], [0, 0, 1, 1], [], []>} : vector<101x200xf32>, vector<200x40xf32>, vector<101x40xf32> -> vector<101x40xf32>
    %c0_4 = arith.constant 0 : index
    %c0_5 = arith.constant 0 : index
    %4 = vector.load %arg3[%c0_4, %c0_5] : memref<1x40xf32, #tpu.memory_space<vmem>>, vector<1x40xf32>
    %5 = vector.broadcast %4 : vector<1x40xf32> to vector<101x40xf32>
    %6 = arith.addf %3, %5 : vector<101x40xf32>
    %7 = arith.mulf %6, %6 : vector<101x40xf32>
    %c0_6 = arith.constant 0 : index
    %c0_7 = arith.constant 0 : index
    %8 = vector.load %arg4[%c0_6, %c0_7] : memref<2x101xf32, #tpu.memory_space<vmem>>, vector<2x101xf32>
    %cst_8 = arith.constant dense<0.000000e+00> : vector<2x40xf32>
    %9 = tpu.matmul %8, %7, %cst_8 {dimension_numbers = #tpu.dot_dimension_numbers<[1], [0], [0], [1], [0, 0, 1, 1], [], []>} : vector<2x101xf32>, vector<101x40xf32>, vector<2x40xf32> -> vector<2x40xf32>
    %cst_9 = arith.constant 9.99999997E-7 : f32
    %10 = vector.broadcast %cst_9 : f32 to vector<2x40xf32>
    %11 = arith.maximumf %9, %10 : vector<2x40xf32>
    %12 = math.log %11 : vector<2x40xf32>
    %13 = vector.extract_strided_slice %12 {offsets = [0, 0], sizes = [1, 40], strides = [1, 1]} : vector<2x40xf32> to vector<1x40xf32>
    %14 = vector.extract_strided_slice %12 {offsets = [1, 0], sizes = [1, 40], strides = [1, 1]} : vector<2x40xf32> to vector<1x40xf32>
    %15 = tpu.concatenate %13, %14 in 1 : vector<1x40xf32>, vector<1x40xf32> -> vector<1x80xf32>
    %c0_10 = arith.constant 0 : index
    %c0_11 = arith.constant 0 : index
    %16 = vector.load %arg5[%c0_10, %c0_11] : memref<80x4xf32, #tpu.memory_space<vmem>>, vector<80x4xf32>
    %cst_12 = arith.constant dense<0.000000e+00> : vector<1x4xf32>
    %17 = tpu.matmul %15, %16, %cst_12 {dimension_numbers = #tpu.dot_dimension_numbers<[1], [0], [0], [1], [0, 0, 1, 1], [], []>} : vector<1x80xf32>, vector<80x4xf32>, vector<1x4xf32> -> vector<1x4xf32>
    %c0_13 = arith.constant 0 : index
    %c0_14 = arith.constant 0 : index
    %18 = vector.load %arg6[%c0_13, %c0_14] : memref<1x4xf32, #tpu.memory_space<vmem>>, vector<1x4xf32>
    %19 = arith.addf %17, %18 : vector<1x4xf32>
    %cst_15 = arith.constant dense<0xFF800000> : vector<1xf32>
    %20 = vector.multi_reduction <maximumf>, %19, %cst_15 [1] : vector<1x4xf32> to vector<1xf32>
    %21 = vector.shape_cast %20 : vector<1xf32> to vector<1x1xf32>
    %22 = vector.broadcast %21 : vector<1x1xf32> to vector<1x4xf32>
    %23 = arith.subf %19, %22 : vector<1x4xf32>
    %24 = math.exp %23 : vector<1x4xf32>
    %cst_16 = arith.constant dense<0.000000e+00> : vector<1xf32>
    %25 = vector.multi_reduction <add>, %24, %cst_16 [1] : vector<1x4xf32> to vector<1xf32>
    %26 = vector.shape_cast %25 : vector<1xf32> to vector<1x1xf32>
    %27 = math.log %26 : vector<1x1xf32>
    %28 = vector.broadcast %27 : vector<1x1xf32> to vector<1x4xf32>
    %29 = arith.subf %23, %28 : vector<1x4xf32>
    %c0_17 = arith.constant 0 : index
    %c0_18 = arith.constant 0 : index
    %c0_19 = arith.constant 0 : index
    %30 = vector.load %arg7[%c0_17, %c0_18, %c0_19] : memref<1x1x4xf32, #tpu.memory_space<vmem>>, vector<1x1x4xf32>
    %31 = vector.shape_cast %30 : vector<1x1x4xf32> to vector<1x4xf32>
    %32 = vector.shape_cast %29 : vector<1x4xf32> to vector<1x1x4xf32>
    tpu.vector_store %arg7[%c0_17, %c0_18, %c0_19], %32 {strides = array<i32>} : memref<1x1x4xf32, #tpu.memory_space<vmem>>, vector<1x1x4xf32>,
    return
  }
  func.func @transform_0(%arg0: i32) -> (i32, i32, i32) {
    %c0_i32 = arith.constant 0 : i32
    %c0_i32_0 = arith.constant 0 : i32
    %c0_i32_1 = arith.constant 0 : i32
    return %arg0, %c0_i32, %c0_i32_0 : i32, i32, i32
  }
  func.func @transform_1(%arg0: i32) -> (i32, i32) {
    %c0_i32 = arith.constant 0 : i32
    %c0_i32_0 = arith.constant 0 : i32
    %c0_i32_1 = arith.constant 0 : i32
    return %c0_i32, %c0_i32_0 : i32, i32
  }
  func.func @transform_2(%arg0: i32) -> (i32, i32) {
    %c0_i32 = arith.constant 0 : i32
    %c0_i32_0 = arith.constant 0 : i32
    %c0_i32_1 = arith.constant 0 : i32
    return %c0_i32, %c0_i32_0 : i32, i32
  }
  func.func @transform_3(%arg0: i32) -> (i32, i32) {
    %c0_i32 = arith.constant 0 : i32
    %c0_i32_0 = arith.constant 0 : i32
    %c0_i32_1 = arith.constant 0 : i32
    return %c0_i32, %c0_i32_0 : i32, i32
  }
  func.func @transform_4(%arg0: i32) -> (i32, i32) {
    %c0_i32 = arith.constant 0 : i32
    %c0_i32_0 = arith.constant 0 : i32
    %c0_i32_1 = arith.constant 0 : i32
    return %c0_i32, %c0_i32_0 : i32, i32
  }
  func.func @transform_5(%arg0: i32) -> (i32, i32) {
    %c0_i32 = arith.constant 0 : i32
    %c0_i32_0 = arith.constant 0 : i32
    %c0_i32_1 = arith.constant 0 : i32
    return %c0_i32, %c0_i32_0 : i32, i32
  }
  func.func @transform_6(%arg0: i32) -> (i32, i32, i32) {
    %c0_i32 = arith.constant 0 : i32
    %c0_i32_0 = arith.constant 0 : i32
    %c0_i32_1 = arith.constant 0 : i32
    return %arg0, %c0_i32, %c0_i32_0 : i32, i32, i32
  }
}

</mosaic_0001>

<bundles_post_ra>
// kernel: tpu_custom_call.1
= control target key start
LH: loop header
LB: loop body
LE: loop exit
PB: predicated region body
PF: predicated region fallthrough
CT: control target
= control target key end

     0   :  { %11 = vsyncpa [#allocation3], 0  ;;  %s1373_s0 = inlined_call_operand.vmem [shape: f32[2,101,200], index: 0, kind: input, shape index: {}]   ;;  %s1374_s1 = inlined_call_operand.vmem [shape: f32[200,40], index: 1, kind: input, shape index: {}]   ;;  %s1375_s2 = inlined_call_operand.vmem [shape: f32[1,40], index: 2, kind: input, shape index: {}]   ;;  %s1376_s3 = inlined_call_operand.vmem [shape: f32[2,101], index: 3, kind: input, shape index: {}]   ;;  %s1377_s4 = inlined_call_operand.vmem [shape: f32[80,4], index: 4, kind: input, shape index: {}]   ;;  %s1378_s5 = inlined_call_operand.vmem [shape: f32[1,4], index: 5, kind: input, shape index: {}]   ;;  %s1379_s6 = inlined_call_operand.hbm [shape: f32[2,1,4], index: 6, kind: output, shape index: {}]  }
   0x1   :  { %13 = vsyncpa [#allocation3 + $0x1], 0  ;;  %s1071_s21 = smov 0   ;;  %s1073_s22 = smov 0  }
   0x2   :  { %s1075_s23 = smov 0   ;;  %s1077_s24 = smov 0  }
   0x3 LB: > { %s1092_s25 = sadd.s32 4294967295, %s1029_s24   ;;  %s746_s26 = sadd.s32 4294967294, %s1029_s24   ;;  %s1029_s24 = sphi %s1077_s24, %s1385_s24   ;;  %s1025_s23 = sphi %s1075_s23, %s1384_s23   ;;  %s1021_s22 = sphi %s1073_s22, %s1383_s22   ;;  %s1017_s21 = sphi %s1071_s21, %s1382_s21  }
   0x4   : > { %s1096_s27 = sadd.s32 1, %s1029_s24   ;;  %s157_s28 = sadd.s32 1, %s1025_s23 }
   0x5   : > { %s154_s29 = ssub.s32 %s1029_s24, %s1096_s27  ;;  %p167_p0 = scmp.ne.s32.totalorder %s1025_s23, %s1021_s22 }
   0x6   : > { %p155_p1 = scmp.eq.s32.totalorder %s154_s29, 0  ;;  %p168_p2 = scmp.eq.s32.totalorder %s1092_s25, 1 }
   0x7   : > { %p173_p3 = scmp.ne.s32.totalorder %s1021_s22, %s1017_s21  ;;  %p174_p4 = scmp.eq.s32.totalorder %s746_s26, 1 }
   0x8   : > { %s1107_s30 = scalar_select %p155_p1, %s1025_s23, %s157_s28  }
   0x9   : > { %p1109_p5 = por %p168_p2, %p167_p0  ;;  %p1113_p6 = por %p174_p4, %p173_p3 }
   0xa   : > { %p749_p7 = scmp.ge.s32.totalorder %s1029_s24, 1  ;;  %p215_p8 = scmp.lt.s32.totalorder %s1029_s24, 3 }
   0xc   : > { %p216_p9 = pnand %p749_p7, %p215_p8 }
   0xd   : > { %v275_v0 = vld [vmem:[%s1374_s1] sm:$0xff] (!%p216_p9)  ;;  %v276_v1 = vld [vmem:[%s1374_s1 + $0x8] sm:$0xff] (!%p216_p9)  ;;  %v277_v2 = vld [vmem:[%s1374_s1 + $0x10] sm:$0xff] (!%p216_p9)  ;;  %p244_p10 = scmp.lt.s32.totalorder (!%p216_p9), %s1092_s25, 1  ;;  %v1031_v3 = vmov (!%p216_p9), 0.0|0.0   ;;  %vm307_vm0 = vcmask (!%p216_p9), 588800  }
   0xe   : > { %219 = sbr.rel (%p216_p9) target bundleno = 1221 (0x4c5), region = 44  ;;  %848 = vmatprep.subr.bf16.mxu0 (!%p216_p9), %v1031_v3  ;;  %v849_v4 = vpack.c.bf16 (!%p216_p9), %v276_v1, %v275_v0  ;;  %v278_v5 = vld [vmem:[%s1374_s1 + $0x18] sm:$0xff] (!%p216_p9)  ;;  %884 = vmatprep.subr.bf16.mxu1 (!%p216_p9), %v1031_v3  ;;  %v279_v7 = vld [vmem:[%s1374_s1 + $0x20] sm:$0xff] (!%p216_p9)  ;;  %v280_v8 = vld [vmem:[%s1374_s1 + $0x28] sm:$0xff] (!%p216_p9)  ;;  %v1032_v38 = vmov (!%p216_p9), 0.0   ;;  %vm1033_vm1 = vmmov (!%p216_p9), 0  }
   0xf   : > { %v852_v6 = vpack.c.bf16 (!%p216_p9), %v278_v5, %v277_v2  ;;  %v855_v9 = vpack.c.bf16 (!%p216_p9), %v280_v8, %v279_v7  ;;  %v281_v10 = vld [vmem:[%s1374_s1 + $0x30] sm:$0xff] (!%p216_p9)  ;;  %v282_v11 = vld [vmem:[%s1374_s1 + $0x38] sm:$0xff] (!%p216_p9)  ;;  %v283_v14 = vld [vmem:[%s1374_s1 + $0x40] sm:$0xff] (!%p216_p9)  ;;  %822 = vmatprep.mubr.msk.f32.mxu1 (!%p216_p9), %vm1033_vm1, %v1032_v38  ;;  %vm495_vm2 = vcmask (!%p216_p9), 1044480   ;;  %vm491_vm3 = vcmask (!%p216_p9), 826368   ;;  %s1034_s15 = smov (!%p216_p9), 40  }
  0x10   : > { %850 = vmatpush1.bf16.msra.mxu0 (!%p216_p9), %v849_v4  ;;  %v858_v13 = vpack.c.bf16 (!%p216_p9), %v282_v11, %v281_v10  ;;  %v284_v15 = vld [vmem:[%s1374_s1 + $0x48] sm:$0xff] (!%p216_p9)  ;;  %v285_v17 = vld [vmem:[%s1374_s1 + $0x50] sm:$0xff] (!%p216_p9)  ;;  %v286_v18 = vld [vmem:[%s1374_s1 + $0x58] sm:$0xff] (!%p216_p9)  ;;  %vm577_vm4 = vcmask (!%p216_p9), 326656   ;;  %vm590_vm5 = vcmask (!%p216_p9), 654336   ;;  %vm664_vm6 = vcmask (!%p216_p9), 24576  }
  0x11   : > { %851 = vmatprep.subr.bf16.mxu0 (!%p216_p9), %v1031_v3  ;;  %v861_v16 = vpack.c.bf16 (!%p216_p9), %v284_v15, %v283_v14  ;;  %v864_v19 = vpack.c.bf16 (!%p216_p9), %v286_v18, %v285_v17  ;;  %v287_v20 = vld [vmem:[%s1374_s1 + $0x60] sm:$0xff] (!%p216_p9)  ;;  %v288_v21 = vld [vmem:[%s1374_s1 + $0x68] sm:$0xff] (!%p216_p9)  ;;  %v289_v23 = vld [vmem:[%s1374_s1 + $0x70] sm:$0xff] (!%p216_p9)  ;;  %s242_s18 = sand.u32 (!%p216_p9), 1, %s1021_s22   ;;  %s768_s19 = sshll.u32 (!%p216_p9), %s1092_s25, 4 }
  0x12   : > { %v867_v22 = vpack.c.bf16 (!%p216_p9), %v288_v21, %v287_v20  ;;  %v290_v24 = vld [vmem:[%s1374_s1 + $0x78] sm:$0xff] (!%p216_p9)  ;;  %v291_v26 = vld [vmem:[%s1374_s1 + $0x80] sm:$0xff] (!%p216_p9)  ;;  %v292_v27 = vld [vmem:[%s1374_s1 + $0x88] sm:$0xff] (!%p216_p9)  ;;  %s243_s20 = scalar_lea.vmem (!%p216_p9), [#allocation2], %s242_s18  ;;  %s1330_s29 = scalar_lea.hbm (!%p216_p9), %s1379_s6, %s768_s19 }
  0x13   : > { %v870_v25 = vpack.c.bf16 (!%p216_p9), %v290_v24, %v289_v23  ;;  %v873_v28 = vpack.c.bf16 (!%p216_p9), %v292_v27, %v291_v26  ;;  %v293_v29 = vld [vmem:[%s1374_s1 + $0x90] sm:$0xff] (!%p216_p9)  ;;  %v294_v30 = vld [vmem:[%s1374_s1 + $0x98] sm:$0xff] (!%p216_p9)  ;;  %v295_v32 = vld [vmem:[%s1374_s1 + $0xa0] sm:$0xff] (!%p216_p9)  ;;  %s691_s26 = sshll.u32 (!%p216_p9), %s243_s20, 4  ;;  %s679_s9 = scalar_lea.sflag (!%p216_p9), [#allocation3], %s242_s18  ;;  %s1332_s26 = int_to_ptr.vmem [resolvable:$true] %s691_s26 }
  0x14   : > { %853 = vmatpush1.bf16.msra.mxu0 (!%p216_p9), %v852_v6  ;;  %v876_v31 = vpack.c.bf16 (!%p216_p9), %v294_v30, %v293_v29  ;;  %v296_v33 = vld [vmem:[%s1374_s1 + $0xa8] sm:$0xff] (!%p216_p9)  ;;  %v297_v35 = vld [vmem:[%s1374_s1 + $0xb0] sm:$0xff] (!%p216_p9)  ;;  %v298_v36 = vld [vmem:[%s1374_s1 + $0xb8] sm:$0xff] (!%p216_p9)  ;;  %s967_s11 = scalar_lea.vmem (!%p216_p9), %s1332_s26, 16 }
  0x15   : > { %s245_s17 = scalar_select %p244_p10, %s1092_s25, 1  ;;  %854 = vmatprep.subr.bf16.mxu0 %v1031_v3  ;;  %v879_v34 = vpack.c.bf16 %v296_v33, %v295_v32  ;;  %v882_v37 = vpack.c.bf16 %v298_v36, %v297_v35  ;;  %v299_v39 = vld [vmem:[%s1374_s1 + $0xc0] sm:$0xff] }
  0x16   : > { %v1259_v1 = vld [vmem:[%s1375_s2] ss:$0 sm:$0xff]  ;;  %p968_p11 = scmp.ne.s32.totalorder %s1332_s26, %s967_s11  ;;  %s1035_s25 = smov [#allocation2]  }
  0x17   : > { %s917_s28 = smul.u32 208, %s245_s17  ;;  %s971_s12 = sshll.u32 %s1035_s25, 4  ;;  %s972_s12 = int_to_ptr.vmem [resolvable:$false] %s971_s12 }
  0x18   : > { %856 = vmatpush1.bf16.msra.mxu0 %v855_v9  ;;  %p969_p12 = pnand %p968_p11, %p1109_p5  ;;  %s973_s13 = scalar_lea.vmem %s972_s12, 32 }
  0x19   : > { %s1145_s10 = scalar_lea.vmem %s1373_s0, %s917_s28  ;;  %857 = vmatprep.subr.bf16.mxu0 %v1031_v3  ;;  %p974_p0 = scmp.lt.s32.totalorder %s1332_s26, %s972_s12 }
  0x1a   : > { %v250_v12 = vld [vmem:[%s1145_s10 + $0x8] sm:$0xff]  ;;  %v249_v40 = vld [vmem:[%s1145_s10] sm:$0xff]  ;;  %v252_v41 = vld [vmem:[%s1145_s10 + $0x18] sm:$0xff]  ;;  %p970_p13 = pneg %p969_p12  ;;  %p975_p1 = scmp.lt.s32.totalorder %s973_s13, %s967_s11 }
  0x1b   : > { %752 = vmatprep.mubr.msk.f32.mxu0 %vm307_vm0, %v250_v12  ;;  %v251_v42 = vld [vmem:[%s1145_s10 + $0x10] sm:$0xff]  ;;  %v254_v43 = vld [vmem:[%s1145_s10 + $0x28] sm:$0xff]  ;;  %v253_v44 = vld [vmem:[%s1145_s10 + $0x20] sm:$0xff] }
  0x1c   : > { %859 = vmatpush1.bf16.msra.mxu0 %v858_v13  ;;  %v256_v45 = vld [vmem:[%s1145_s10 + $0x38] sm:$0xff]  ;;  %v255_v46 = vld [vmem:[%s1145_s10 + $0x30] sm:$0xff]  ;;  %v258_v47 = vld [vmem:[%s1145_s10 + $0x48] sm:$0xff]  ;;  %p976_p2 = por %p975_p1, %p974_p0 }
  0x1d   : > { %860 = vmatprep.subr.bf16.mxu0 %v1031_v3  ;;  %v257_v48 = vld [vmem:[%s1145_s10 + $0x40] sm:$0xff]  ;;  %v260_v49 = vld [vmem:[%s1145_s10 + $0x58] sm:$0xff]  ;;  %v259_v50 = vld [vmem:[%s1145_s10 + $0x50] sm:$0xff] }
  0x1e   : > { %v262_v51 = vld [vmem:[%s1145_s10 + $0x68] sm:$0xff]  ;;  %v261_v52 = vld [vmem:[%s1145_s10 + $0x60] sm:$0xff]  ;;  %v264_v53 = vld [vmem:[%s1145_s10 + $0x78] sm:$0xff]  ;;  %p977_p3 = pnand %p976_p2, %p970_p13 }
  0x1f   : > { %v263_v54 = vld [vmem:[%s1145_s10 + $0x70] sm:$0xff]  ;;  %v266_v55 = vld [vmem:[%s1145_s10 + $0x88] sm:$0xff]  ;;  %v265_v56 = vld [vmem:[%s1145_s10 + $0x80] sm:$0xff] }
  0x20   : > { %862 = vmatpush1.bf16.msra.mxu0 %v861_v16  ;;  %v268_v57 = vld [vmem:[%s1145_s10 + $0x98] sm:$0xff]  ;;  %v267_v58 = vld [vmem:[%s1145_s10 + $0x90] sm:$0xff]  ;;  %v270_v59 = vld [vmem:[%s1145_s10 + $0xa8] sm:$0xff] }
  0x21   : > { %863 = vmatprep.subr.bf16.mxu0 %v1031_v3  ;;  %v269_v60 = vld [vmem:[%s1145_s10 + $0xa0] sm:$0xff]  ;;  %v272_v61 = vld [vmem:[%s1145_s10 + $0xb8] sm:$0xff]  ;;  %v271_v62 = vld [vmem:[%s1145_s10 + $0xb0] sm:$0xff] }
  0x22   : > { %v274_v63 = vld [vmem:[%s1145_s10 + $0xc8] sm:$0x1f]  ;;  %v273_v0 = vld [vmem:[%s1145_s10 + $0xc0] sm:$0x1f] }
  0x24   : > { %865 = vmatpush1.bf16.msra.mxu0 %v864_v19 }
  0x25   : > { %866 = vmatprep.subr.bf16.mxu0 %v1031_v3 }
  0x28   : > { %868 = vmatpush1.bf16.msra.mxu0 %v867_v22 }
  0x29   : > { %869 = vmatprep.subr.bf16.mxu0 %v1031_v3 }
  0x2c   : > { %871 = vmatpush1.bf16.msra.mxu0 %v870_v25 }
  0x2d   : > { %872 = vmatprep.subr.bf16.mxu0 %v1031_v3 }
  0x30   : > { %874 = vmatpush1.bf16.msra.mxu0 %v873_v28 }
  0x31   : > { %875 = vmatprep.subr.bf16.mxu0 %v1031_v3 }
  0x34   : > { %877 = vmatpush1.bf16.msra.mxu0 %v876_v31 }
  0x35   : > { %878 = vmatprep.subr.bf16.mxu0 %v1031_v3 }
  0x38   : > { %880 = vmatpush1.bf16.msra.mxu0 %v879_v34 }
  0x39   : > { %881 = vmatprep.subr.bf16.mxu0 %v1031_v3 }
  0x3c   : > { %883 = vmatpush1.bf16.msra.mxu0 %v882_v37 }
  0x3d   : > { %395 = vmatprep.subr.mxu0 %v1032_v38 }
  0x40   : > { %396 = vmatpush1.msra.mxu0 %v299_v39 }
  0x41   : > { %412 = vmatmul.mubr.f32.vlgmr.msra.gmra.mrb[0].mxu0 %v249_v40 }
  0x42   : > { %753 = vmatprep.mubr.msk.f32.mxu0 %vm307_vm0, %v252_v41 }
  0x45   : > { %417 = vmatmul.mubr.f32.gmra.mrb[2].mxu0 %v251_v42 }
  0x46   : > { %754 = vmatprep.mubr.msk.f32.mxu0 %vm307_vm0, %v254_v43 }
  0x49   : > { %422 = vmatmul.mubr.f32.gmra.mrb[4].mxu0 %v253_v44 }
  0x4a   : > { %755 = vmatprep.mubr.msk.f32.mxu0 %vm307_vm0, %v256_v45 }
  0x4d   : > { %427 = vmatmul.mubr.f32.gmra.mrb[6].mxu0 %v255_v46 }
  0x4e   : > { %756 = vmatprep.mubr.msk.f32.mxu0 %vm307_vm0, %v258_v47 }
  0x51   : > { %432 = vmatmul.mubr.f32.gmra.mrb[8].mxu0 %v257_v48 }
  0x52   : > { %757 = vmatprep.mubr.msk.f32.mxu0 %vm307_vm0, %v260_v49 }
  0x55   : > { %437 = vmatmul.mubr.f32.gmra.mrb[10].mxu0 %v259_v50 }
  0x56   : > { %758 = vmatprep.mubr.msk.f32.mxu0 %vm307_vm0, %v262_v51 }
  0x59   : > { %442 = vmatmul.mubr.f32.gmra.mrb[12].mxu0 %v261_v52 }
  0x5a   : > { %759 = vmatprep.mubr.msk.f32.mxu0 %vm307_vm0, %v264_v53 }
  0x5d   : > { %447 = vmatmul.mubr.f32.gmra.mrb[14].mxu0 %v263_v54 }
  0x5e   : > { %760 = vmatprep.mubr.msk.f32.mxu0 %vm307_vm0, %v266_v55 }
  0x61   : > { %452 = vmatmul.mubr.f32.gmra.mrb[16].mxu0 %v265_v56 }
  0x62   : > { %761 = vmatprep.mubr.msk.f32.mxu0 %vm307_vm0, %v268_v57 }
  0x65   : > { %457 = vmatmul.mubr.f32.gmra.mrb[18].mxu0 %v267_v58 }
  0x66   : > { %762 = vmatprep.mubr.msk.f32.mxu0 %vm307_vm0, %v270_v59 }
  0x69   : > { %462 = vmatmul.mubr.f32.gmra.mrb[20].mxu0 %v269_v60 }
  0x6a   : > { %763 = vmatprep.mubr.msk.f32.mxu0 %vm307_vm0, %v272_v61 }
  0x6d   : > { %467 = vmatmul.mubr.f32.gmra.mrb[22].mxu0 %v271_v62  ;;  %v490_v62 = vld [vmem:[%s1376_s3] sm:$0x3] }
  0x6e   : > { %764 = vmatprep.mubr.msk.f32.mxu0 %vm307_vm0, %v274_v63  ;;  %v579_v63 = vld [vmem:[%s1377_s4] sm:$0xff] }
  0x71   : > { %472 = vmatmul.mubr.f32.gmra.mrb[24].mxu0 %v273_v0  ;;  %v580_v0 = vld [vmem:[%s1377_s4 + $0x8] sm:$0xff] }
 0x114   : > { %v413_v2 = vpop.f32.mrb[0].mxu0 }
 0x115   : > { %v415_v4 = vpop.f32.mrb[1].mxu0  ;;  %v414_v5 = vadd.f32 %v1259_v1, %v413_v2  ;;  %v903_v2 = vpack.c.bf16 %v580_v0, %v579_v63 }
 0x116   : > { %v582_v4 = vld [vmem:[%s1377_s4 + $0x18] sm:$0xff] }
 0x117   : > { %v477_v9 = vmul.f32 %v414_v5, %v414_v5 }
 0x118   : > { %v418_v6 = vpop.f32.mrb[2].mxu0 }
 0x119   : > { %v419_v7 = vadd.f32 %v1259_v1, %v418_v6  ;;  %v420_v8 = vpop.f32.mrb[3].mxu0  ;;  %v584_v6 = vld [vmem:[%s1377_s4 + $0x28] sm:$0xff] }
 0x11a   : > { %v585_v8 = vld [vmem:[%s1377_s4 + $0x30] sm:$0xff] }
 0x11b   : > { %v478_v10 = vmul.f32 %v419_v7, %v419_v7 }
 0x11c   : > { %v423_v11 = vpop.f32.mrb[4].mxu0 }
 0x11d   : > { %v425_v12 = vpop.f32.mrb[5].mxu0  ;;  %v885_v13 = vpack.c.bf16 %v478_v10, %v477_v9  ;;  %v424_v14 = vadd.f32 %v1259_v1, %v423_v11  ;;  %v586_v9 = vld [vmem:[%s1377_s4 + $0x38] sm:$0xff]  ;;  %v587_v11 = vld [vmem:[%s1377_s4 + $0x40] sm:$0xff] }
 0x11e   : > { %v912_v10 = vpack.c.bf16 %v586_v9, %v585_v8  ;;  %v588_v12 = vld [vmem:[%s1377_s4 + $0x48] sm:$0xff] }
 0x11f   : > { %886 = vmatpush3.bf16.msra.mxu1 %v885_v13  ;;  %v479_v18 = vmul.f32 %v424_v14, %v424_v14  ;;  %v915_v13 = vpack.c.bf16 %v588_v12, %v587_v11 }
 0x120   : > { %v428_v15 = vpop.f32.mrb[6].mxu0  ;;  %887 = vmatprep.subr.bf16.mxu1 %v1031_v3 }
 0x121   : > { %v429_v16 = vadd.f32 %v1259_v1, %v428_v15  ;;  %v430_v17 = vpop.f32.mrb[7].mxu0 }
 0x123   : > { %v480_v19 = vmul.f32 %v429_v16, %v429_v16 }
 0x124   : > { %v433_v20 = vpop.f32.mrb[8].mxu0 }
 0x125   : > { %v888_v21 = vpack.c.bf16 %v480_v19, %v479_v18  ;;  %v435_v22 = vpop.f32.mrb[9].mxu0  ;;  %v434_v23 = vadd.f32 %v1259_v1, %v433_v20 }
 0x126   : > { %v589_v22 = vld [vmem:[%s1378_s5] sm:$0x1] }
 0x127   : > { %889 = vmatpush3.bf16.msra.mxu1 %v888_v21  ;;  %v481_v27 = vmul.f32 %v434_v23, %v434_v23 }
 0x128   : > { %v438_v24 = vpop.f32.mrb[10].mxu0  ;;  %890 = vmatprep.subr.bf16.mxu1 %v1031_v3 }
 0x129   : > { %v439_v25 = vadd.f32 %v1259_v1, %v438_v24  ;;  %v440_v26 = vpop.f32.mrb[11].mxu0 }
 0x12b   : > { %v482_v28 = vmul.f32 %v439_v25, %v439_v25 }
 0x12c   : > { %v443_v29 = vpop.f32.mrb[12].mxu0 }
 0x12d   : > { %v891_v30 = vpack.c.bf16 %v482_v28, %v481_v27  ;;  %v445_v31 = vpop.f32.mrb[13].mxu0  ;;  %v444_v32 = vadd.f32 %v1259_v1, %v443_v29 }
 0x12f   : > { %892 = vmatpush3.bf16.msra.mxu1 %v891_v30  ;;  %v483_v36 = vmul.f32 %v444_v32, %v444_v32 }
 0x130   : > { %v448_v33 = vpop.f32.mrb[14].mxu0  ;;  %893 = vmatprep.subr.bf16.mxu1 %v1031_v3 }
 0x131   : > { %v449_v34 = vadd.f32 %v1259_v1, %v448_v33  ;;  %v450_v35 = vpop.f32.mrb[15].mxu0 }
 0x133   : > { %v484_v37 = vmul.f32 %v449_v34, %v449_v34 }
 0x134   : > { %v453_v39 = vpop.f32.mrb[16].mxu0 }
 0x135   : > { %v894_v40 = vpack.c.bf16 %v484_v37, %v483_v36  ;;  %v455_v41 = vpop.f32.mrb[17].mxu0  ;;  %v454_v42 = vadd.f32 %v1259_v1, %v453_v39 }
 0x137   : > { %895 = vmatpush3.bf16.msra.mxu1 %v894_v40  ;;  %v485_v46 = vmul.f32 %v454_v42, %v454_v42 }
 0x138   : > { %v458_v43 = vpop.f32.mrb[18].mxu0  ;;  %896 = vmatprep.subr.bf16.mxu1 %v1031_v3 }
 0x139   : > { %v459_v44 = vadd.f32 %v1259_v1, %v458_v43  ;;  %v460_v45 = vpop.f32.mrb[19].mxu0 }
 0x13b   : > { %v486_v47 = vmul.f32 %v459_v44, %v459_v44 }
 0x13c   : > { %v463_v48 = vpop.f32.mrb[20].mxu0 }
 0x13d   : > { %v897_v49 = vpack.c.bf16 %v486_v47, %v485_v46  ;;  %v465_v50 = vpop.f32.mrb[21].mxu0  ;;  %v464_v51 = vadd.f32 %v1259_v1, %v463_v48 }
 0x13f   : > { %898 = vmatpush3.bf16.msra.mxu1 %v897_v49  ;;  %v487_v55 = vmul.f32 %v464_v51, %v464_v51 }
 0x140   : > { %v468_v52 = vpop.f32.mrb[22].mxu0  ;;  %899 = vmatprep.subr.bf16.mxu1 %v1031_v3 }
 0x141   : > { %v469_v53 = vadd.f32 %v1259_v1, %v468_v52  ;;  %v470_v54 = vpop.f32.mrb[23].mxu0 }
 0x143   : > { %v488_v56 = vmul.f32 %v469_v53, %v469_v53 }
 0x144   : > { %v473_v57 = vpop.f32.mrb[24].mxu0 }
 0x145   : > { %v900_v58 = vpack.c.bf16 %v488_v56, %v487_v55  ;;  %v474_v59 = vadd.f32 %v1259_v1, %v473_v57  ;;  %v475_v60 = vpop.f32.mrb[25].mxu0  ;;  %v581_v1 = vld [vmem:[%s1377_s4 + $0x10] sm:$0xff] }
 0x146   : > { %v906_v5 = vpack.c.bf16 %v582_v4, %v581_v1 }
 0x147   : > { %v489_v61 = vmul.f32 %v474_v59, %v474_v59  ;;  %901 = vmatpush3.bf16.msra.mxu1 %v900_v58 }
 0x148   : > { %820 = vmatprep.subr.mxu1 %v1032_v38 }
 0x14b   : > { %821 = vmatpush3.msk.msra.mxu1 %vm495_vm2, %v489_v61 }
 0x14c   : > { %823 = vmatmul.mubr.msk.f32.vlgmr.msra.gmra.mrb[0].mxu1 %vm491_vm3, %v490_v62  ;;  %902 = vmatprep.subr.bf16.mxu1 %v1031_v3 }
 0x14d   : > { %845 = vmatprep.mubr.msk.f32.mxu1 %vm1033_vm1, %v1032_v38  ;;  %904 = vmatpush3.bf16.msra.mxu1 %v903_v2  ;;  %v583_v38 = vld [vmem:[%s1377_s4 + $0x20] sm:$0xff] }
 0x14e   : > { %905 = vmatprep.subr.bf16.mxu1 %v1031_v3  ;;  %v909_v7 = vpack.c.bf16 %v584_v6, %v583_v38 }
 0x151   : > { %907 = vmatpush3.bf16.msra.mxu1 %v906_v5 }
 0x152   : > { %908 = vmatprep.subr.bf16.mxu1 %v1031_v3 }
 0x155   : > { %910 = vmatpush3.bf16.msra.mxu1 %v909_v7 }
 0x156   : > { %911 = vmatprep.subr.bf16.mxu1 %v1031_v3 }
 0x159   : > { %913 = vmatpush3.bf16.msra.mxu1 %v912_v10 }
 0x15a   : > { %914 = vmatprep.subr.bf16.mxu1 %v1031_v3 }
 0x15d   : > { %916 = vmatpush3.bf16.msra.mxu1 %v915_v13 }
 0x21f   : > { %v565_v14 = vpop.f32.mrb[0].mxu1 }
 0x220   : > { %v569_v15 = vmax.f32 %v565_v14, 1e-06  ;;  %v824_v16 = vpop.f32.mrb[1].mxu1 }
 0x222   : > { %961 = vlog2.f32 %v569_v15 }
 0x22c   : > { %v962_v17 = vpop.eup %961 }
 0x22d   : > { %v571_v18 = vmul.f32 0.6931472, %v962_v17 }
 0x22f   : > { %v573_v19 = vrot.slane %v571_v18, 1 }
 0x231   : > { %574 = vrot.lane.b32.xlu0 %v573_v19, %s1034_s15 }
 0x2a3   : > { %v575_v20 = vpop.permute.xlu0 %574 }
 0x2a4   : > { %v578_v21 = vsel %vm577_vm4, %v571_v18, %v575_v20 }
 0x2a5   : > { %846 = vmatmul.mubr.msk.f32.vlgmr.msra.gmra.mrb[2].mxu1 %vm590_vm5, %v578_v21 }
 0x378   : > { %v660_v3 = vpop.f32.mrb[2].mxu1 }
 0x379   : > { %v661_v23 = vadd.f32 %v660_v3, %v589_v22  ;;  %v847_v24 = vpop.f32.mrb[3].mxu1 }
 0x37b   : > { %v665_v25 = vsel %vm664_vm6, %v661_v23, -inf }
 0x37c   : > { %666 = vmax.xlane.f32.xlu0 %v665_v25 }
 0x409   : > { %v667_v26 = vpop.xlane.xlu0 %666 }
 0x40a   : > { %v668_v27 = vsub.f32 %v661_v23, %v667_v26 }
 0x40c   : > { %v669_v28 = vmul.f32 1.442695, %v668_v27 }
 0x40e   : > { %963 = vpow2.f32 %v669_v28 }
 0x418   : > { %v964_v29 = vpop.eup %963 }
 0x419   : > { %v671_v30 = vsel %vm664_vm6, %v964_v29, 0.0 }
 0x41a   : > { %672 = vadd.xlane.f32.xlu1 %v671_v30 }
 0x4a7   : > { %v673_v31 = vpop.xlane.xlu1 %672 }
 0x4a8   : > { %965 = vlog2.f32 %v673_v31 }
 0x4b2   : > { %v966_v32 = vpop.eup %965 }
 0x4b3   : > { %v675_v33 = vmul.f32 0.6931472, %v966_v32 }
 0x4b5   : > { %v676_v34 = vsub.f32 %v668_v27, %v675_v33 }
 0x4b7   : > { %677 = vst.msk [vmem:[%s243_s20] sm:$0x1] %vm664_vm6, %v676_v34 }
 0x4b8   : > { %980 = shalt.err (!%p977_p3)
}
 0x4b9   : > { %s981_s14 = scalar_lea.hbm %s1330_s29, 16  ;;  %s985_s17 = scalar_lea.hbm %s1379_s6, 32 }
 0x4ba   : > { %p982_p4 = scmp.ne.s32.totalorder %s1330_s29, %s981_s14  ;;  %p986_p9 = scmp.lt.u32.totalorder %s1330_s29, %s1379_s6 }
 0x4bb   : > { %p987_p10 = scmp.lt.u32.totalorder %s985_s17, %s981_s14  ;;  %p989_p12 = scmp.lt.u32.totalorder %s981_s14, %s1330_s29 }
 0x4bc   : > { %p983_p7 = pnand %p982_p4, %p1109_p5 }
 0x4bd   : > { %p988_p11 = por %p987_p10, %p986_p9 }
 0x4be   : > { %p984_p8 = pneg %p983_p7 }
 0x4bf   : > { %p990_p13 = por %p989_p12, %p988_p11 }
 0x4c1   : > { %p991_p0 = pnand %p990_p13, %p984_p8 }
 0x4c3   : > { %994 = shalt.err (!%p991_p0)
}
 0x4c4   : > { %918 = dma.vmem_to_hbm [thread:$0]  (%p1109_p5), %s1332_s26, 16, %s1330_s29, %s679_s9  }
 0x4c5 PF: > { %p924_p1 = scmp.ge.s32.totalorder %s1029_s24, 2  ;;  %s703_s20 = sand.u32 1, %s1017_s21  }
 0x4c6   : > { %s704_s28 = scalar_lea.sflag [#allocation3], %s703_s20 }
 0x4c7   : > { %p921_p2 = pnand %p924_p1, %p1113_p6 }
 0x4c9   : > { %1012 = dma.done.wait (!%p921_p2), %s704_s28, 16  }
 0x4ca   : > { %1014 = vsyncadd (!%p921_p2), %s704_s28, 4294967280  ;;  %p16_p3 = scmp.ge.s32.totalorder %s1096_s27, 4   ;;  %s1382_s21 = smov %s1021_s22 }
 0x4cb   : > { %s1383_s22 = smov %s1025_s23  ;;  %s1384_s23 = smov %s1107_s30 }
 0x4cc   : > { %s1385_s24 = smov %s1096_s27  ;;  %18 = sbr.rel (!%p16_p3) target bundleno = 3 (0x3), region = 79 }
 0x4d3   :  { %708 = vsyncpa [#allocation3], 1 }
 0x4d4   :  { %710 = vsyncpa [#allocation3 + $0x1], 1 }

</bundles_post_ra>
